<compile_context>
chip_gen: v6e
topology: v6e:2x2x1
jax: 0.10.0
libtpu: 0.0.40
codegen_flags: <defaults>
</compile_context>

<pallas_src>
import jax
import jax.numpy as jnp
from jax.experimental import pallas as pl
from jax.experimental.pallas import tpu as pltpu

_LANE = 128     # vreg lane width (hidden-dim padding granularity)
_SUBLANE = 8    # vreg sublane count (f32) -> batch-tile granularity


def _leaky_relu(x, slope=0.01):
    # f32 epilogue (keeps the VPU path f32 even when matmul inputs are bf16).
    return jnp.where(x > 0, x, slope * x)


def _round_up(n, m):
    return ((n + m - 1) // m) * m


def _pad_2d(a, rows, cols):
    pr, pc = rows - a.shape[0], cols - a.shape[1]
    if pr or pc:
        a = jnp.pad(a, ((0, pr), (0, pc)))
    return a


def dnn_kernel(x_ref, w1_ref, b1_ref, w2_ref, b2_ref, w3_ref, b3_ref, o_ref):
    """One batch tile: three MXU matmuls with f32 accumulation + f32 epilogues."""
    w_dtype = w1_ref.dtype  # compute dtype for matmul operands (f32 or bf16)

    # fc1 + leaky_relu (x cast happens here, inside the kernel, not in a
    # separate XLA pass over HBM).
    x = x_ref[...]
    if x.dtype != w_dtype:
        x = x.astype(w_dtype)
    h = jnp.dot(x, w1_ref[...], preferred_element_type=jnp.float32)
    h = _leaky_relu(h + b1_ref[...])

    # fc2 + leaky_relu
    h = jnp.dot(h.astype(w_dtype), w2_ref[...], preferred_element_type=jnp.float32)
    h = _leaky_relu(h + b2_ref[...])

    # output layer (no activation)
    h = jnp.dot(h.astype(w_dtype), w3_ref[...], preferred_element_type=jnp.float32)
    o_ref[...] = (h + b3_ref[...]).astype(o_ref.dtype)


def dnn_forward(x, params, *, block_b=2048, compute_dtype=jnp.float32,
                out_dtype=jnp.float32):
    """x: (B, input_dim) f32; params: dict of w1,b1,w2,b2,w3,b3.

    Weights are (in_features, out_features); biases are (1, out_features).
    Returns (B, output_dim) in `out_dtype` (f32 by default).

    Note: with compute_dtype=bf16, x and weights are quantized to bf16 before
    the matmuls (f32 accumulation) -- an intentional accuracy/bandwidth
    tradeoff for callers that tolerate it.
    """
    w1, b1, w2, b2, w3, b3 = (params[k] for k in ("w1", "b1", "w2", "b2", "w3", "b3"))
    B, d_in = x.shape
    d1, d2, d_out = w1.shape[1], w2.shape[1], w3.shape[1]

    # --- padding: only hidden dims (never hit HBM) are lane-padded ----------
    d1_p = _round_up(d1, _LANE)
    d2_p = _round_up(d2, _LANE)

    # Batch tile: as large as requested, sublane-aligned, but keep >=2 grid
    # steps when the batch allows it so v7x's two TensorCores both get work.
    TB = _round_up(min(block_b, _round_up(B, _SUBLANE)), _SUBLANE)
    if B <= TB and B >= 2 * _SUBLANE:
        TB = _round_up(-(-B // 2), _SUBLANE)
    B_p = _round_up(B, TB)
    grid = (B_p // TB,)

    # Zero-padding of hidden dims is exact: padded hidden cols are 0
    # (leaky_relu(0)==0) and hit zero weight rows in the next layer.
    w1_p = _pad_2d(w1, d_in, d1_p).astype(compute_dtype)
    w2_p = _pad_2d(w2, d1_p, d2_p).astype(compute_dtype)
    w3_p = _pad_2d(w3, d2_p, d_out).astype(compute_dtype)
    b1_p = _pad_2d(b1, 1, d1_p).astype(jnp.float32)
    b2_p = _pad_2d(b2, 1, d2_p).astype(jnp.float32)
    b3_p = b3.astype(jnp.float32)

    # Only pad the batch (cheap: d_in stays unpadded) when TB doesn't divide B.
    x_in = _pad_2d(x, B_p, d_in) if B_p != B else x

    # --- VMEM budget (resident weights + double-buffered streams + f32 acts) -
    x_itemsize = x.dtype.itemsize
    o_itemsize = jnp.dtype(out_dtype).itemsize
    w_itemsize = jnp.dtype(compute_dtype).itemsize
    weight_bytes = ((w1_p.size + w2_p.size + w3_p.size) * w_itemsize
                    + (b1_p.size + b2_p.size + b3_p.size) * 4)
    stream_bytes = 2 * (TB * d_in * x_itemsize + TB * d_out * o_itemsize)
    inter_bytes = TB * (d1_p + d2_p) * 4
    need = weight_bytes + stream_bytes + inter_bytes

    try:
        vmem_cap = int(0.75 * pltpu.get_tpu_info().vmem_capacity_bytes)
    except Exception:
        vmem_cap = 64 * 1024 * 1024  # conservative fallback (v7x-safe)
    vmem_limit = int(min(vmem_cap, max(32 * 1024 * 1024, 2 * need)))
    # TODO(synk): if weight_bytes ever exceeds ~60% of vmem_cap (huge hidden
    # dims on v7x), fall back to tiling the hidden/K dims over a grid axis
    # instead of keeping all three weights VMEM-resident.

    # Cost estimate from UNPADDED logical shapes.
    flops = 2 * B * (d_in * d1 + d1 * d2 + d2 * d_out)
    bytes_accessed = (B * d_in * x_itemsize
                      + (d_in * d1 + d1 * d2 + d2 * d_out) * w_itemsize
                      + (d1 + d2 + d_out) * 4
                      + B * d_out * o_itemsize)
    cost = pl.CostEstimate(flops=flops, transcendentals=0,
                           bytes_accessed=bytes_accessed)

    out_p = pl.pallas_call(
        dnn_kernel,
        out_shape=jax.ShapeDtypeStruct((B_p, d_out), out_dtype),
        grid=grid,
        in_specs=[
            pl.BlockSpec((TB, d_in), lambda i: (i, 0)),       # x: streamed, unpadded lanes
            pl.BlockSpec((d_in, d1_p), lambda i: (0, 0)),     # w1: resident
            pl.BlockSpec((1, d1_p), lambda i: (0, 0)),        # b1: resident
            pl.BlockSpec((d1_p, d2_p), lambda i: (0, 0)),     # w2: resident
            pl.BlockSpec((1, d2_p), lambda i: (0, 0)),        # b2: resident
            pl.BlockSpec((d2_p, d_out), lambda i: (0, 0)),    # w3: resident
            pl.BlockSpec((1, d_out), lambda i: (0, 0)),       # b3: resident
        ],
        out_specs=pl.BlockSpec((TB, d_out), lambda i: (i, 0)),  # unpadded writeback
        compiler_params=pltpu.CompilerParams(
            dimension_semantics=("parallel",),   # megacore-shard batch tiles
            vmem_limit_bytes=vmem_limit,
        ),
        cost_estimate=cost,
    )(x_in, w1_p, b1_p, w2_p, b2_p, w3_p, b3_p)

    return out_p[:B] if B_p != B else out_p


def init_params(key, input_dim, fc1_dim, fc2_dim, output_dim):
    """Deterministic synthetic parameters (same shapes as the nn.Module)."""
    ks = jax.random.split(key, 6)

    def lin(kw, kb, d_in, d_out):
        bound = 1.0 / jnp.sqrt(d_in)  # PyTorch default init range
        w = jax.random.uniform(kw, (d_in, d_out), jnp.float32, -bound, bound)
        b = jax.random.uniform(kb, (1, d_out), jnp.float32, -bound, bound)
        return w, b

    w1, b1 = lin(ks[0], ks[1], input_dim, fc1_dim)
    w2, b2 = lin(ks[2], ks[3], fc1_dim, fc2_dim)
    w3, b3 = lin(ks[4], ks[5], fc2_dim, output_dim)
    return {"w1": w1, "b1": b1, "w2": w2, "b2": b2, "w3": w3, "b3": b3}


def dnn_reference(x, p):
    h1 = _leaky_relu(x @ p["w1"] + p["b1"])
    h2 = _leaky_relu(h1 @ p["w2"] + p["b2"])
    return h2 @ p["w3"] + p["b3"]


if __name__ == "__main__":
    key = jax.random.PRNGKey(0)
    k_x, k_p, k_big = jax.random.split(key, 3)

    batch, input_dim, fc1_dim, fc2_dim, output_dim = 2, 16, 32, 32, 8
    params = init_params(k_p, input_dim, fc1_dim, fc2_dim, output_dim)

    # --- small shape from the module spec, f32 compute ----------------------
    x = jax.random.normal(k_x, (batch, input_dim), jnp.float32)
    out = jax.block_until_ready(dnn_forward(x, params, compute_dtype=jnp.float32))
    ref = dnn_reference(x, params)
    assert out.shape == (batch, output_dim)
    assert jnp.allclose(out, ref, atol=1e-5, rtol=1e-5), "f32 mismatch vs reference"

    # --- larger batch: multiple tiles (even grid count for v7x), bf16 compute
    #     with f32 accumulation, f32 output -----------------------------------
    big_b = 4096
    x_big = jax.random.normal(k_big, (big_b, input_dim), jnp.float32)
    out_big = jax.block_until_ready(
        dnn_forward(x_big, params, block_b=2048, compute_dtype=jnp.bfloat16))
    ref_big = dnn_reference(x_big, params)
    assert out_big.shape == (big_b, output_dim)
    assert jnp.allclose(out_big, ref_big, atol=1e-1, rtol=1e-1), \
        "bf16 mismatch vs reference"

    print("KERNEL_OK")
</pallas_src>

<mosaic_0001>
module attributes {stable_mosaic.version = 11 : i64} {
  func.func @dnn_kernel(%arg0: i32, %arg1: memref<8x16xf32, #tpu.memory_space<vmem>>, %arg2: memref<16x128xf32, #tpu.memory_space<vmem>>, %arg3: memref<1x128xf32, #tpu.memory_space<vmem>>, %arg4: memref<128x128xf32, #tpu.memory_space<vmem>>, %arg5: memref<1x128xf32, #tpu.memory_space<vmem>>, %arg6: memref<128x8xf32, #tpu.memory_space<vmem>>, %arg7: memref<1x8xf32, #tpu.memory_space<vmem>>, %arg8: memref<8x8xf32, #tpu.memory_space<vmem>>) attributes {dimension_semantics = [#tpu.dimension_semantics<parallel>], iteration_bounds = array<i64: 1>, scalar_prefetch = 0 : i64, scratch_operands = 0 : i64, tpu.core_type = #tpu.core_type<tc>, window_params = [{transform_indices = @transform_0, window_bounds = array<i64: 8, 16>}, {pipeline_mode = #tpu.pipeline_mode<synchronous>, transform_indices = @transform_1, window_bounds = array<i64: 16, 128>}, {pipeline_mode = #tpu.pipeline_mode<synchronous>, transform_indices = @transform_2, window_bounds = array<i64: 1, 128>}, {pipeline_mode = #tpu.pipeline_mode<synchronous>, transform_indices = @transform_3, window_bounds = array<i64: 128, 128>}, {pipeline_mode = #tpu.pipeline_mode<synchronous>, transform_indices = @transform_4, window_bounds = array<i64: 1, 128>}, {pipeline_mode = #tpu.pipeline_mode<synchronous>, transform_indices = @transform_5, window_bounds = array<i64: 128, 8>}, {pipeline_mode = #tpu.pipeline_mode<synchronous>, transform_indices = @transform_6, window_bounds = array<i64: 1, 8>}, {transform_indices = @transform_7, window_bounds = array<i64: 8, 8>}]} {
    %c0 = arith.constant 0 : index
    %c0_0 = arith.constant 0 : index
    %0 = vector.load %arg1[%c0, %c0_0] : memref<8x16xf32, #tpu.memory_space<vmem>>, vector<8x16xf32>
    %c0_1 = arith.constant 0 : index
    %c0_2 = arith.constant 0 : index
    %1 = vector.load %arg2[%c0_1, %c0_2] : memref<16x128xf32, #tpu.memory_space<vmem>>, vector<16x128xf32>
    %cst = arith.constant dense<0.000000e+00> : vector<8x128xf32>
    %2 = tpu.matmul %0, %1, %cst {dimension_numbers = #tpu.dot_dimension_numbers<[1], [0], [0], [1], [0, 0, 1, 1], [], []>} : vector<8x16xf32>, vector<16x128xf32>, vector<8x128xf32> -> vector<8x128xf32>
    %c0_3 = arith.constant 0 : index
    %c0_4 = arith.constant 0 : index
    %3 = vector.load %arg3[%c0_3, %c0_4] : memref<1x128xf32, #tpu.memory_space<vmem>>, vector<1x128xf32>
    %4 = vector.broadcast %3 : vector<1x128xf32> to vector<8x128xf32>
    %5 = arith.addf %2, %4 : vector<8x128xf32>
    %cst_5 = arith.constant 0.000000e+00 : f32
    %6 = vector.broadcast %cst_5 : f32 to vector<8x128xf32>
    %7 = arith.cmpf ogt, %5, %6 : vector<8x128xf32>
    %cst_6 = arith.constant 0.00999999977 : f32
    %8 = vector.broadcast %cst_6 : f32 to vector<8x128xf32>
    %9 = arith.mulf %8, %5 : vector<8x128xf32>
    %10 = arith.select %7, %5, %9 : vector<8x128xi1>, vector<8x128xf32>
    %c0_7 = arith.constant 0 : index
    %c0_8 = arith.constant 0 : index
    %11 = vector.load %arg4[%c0_7, %c0_8] : memref<128x128xf32, #tpu.memory_space<vmem>>, vector<128x128xf32>
    %cst_9 = arith.constant dense<0.000000e+00> : vector<8x128xf32>
    %12 = tpu.matmul %10, %11, %cst_9 {dimension_numbers = #tpu.dot_dimension_numbers<[1], [0], [0], [1], [0, 0, 1, 1], [], []>} : vector<8x128xf32>, vector<128x128xf32>, vector<8x128xf32> -> vector<8x128xf32>
    %c0_10 = arith.constant 0 : index
    %c0_11 = arith.constant 0 : index
    %13 = vector.load %arg5[%c0_10, %c0_11] : memref<1x128xf32, #tpu.memory_space<vmem>>, vector<1x128xf32>
    %14 = vector.broadcast %13 : vector<1x128xf32> to vector<8x128xf32>
    %15 = arith.addf %12, %14 : vector<8x128xf32>
    %cst_12 = arith.constant 0.000000e+00 : f32
    %16 = vector.broadcast %cst_12 : f32 to vector<8x128xf32>
    %17 = arith.cmpf ogt, %15, %16 : vector<8x128xf32>
    %cst_13 = arith.constant 0.00999999977 : f32
    %18 = vector.broadcast %cst_13 : f32 to vector<8x128xf32>
    %19 = arith.mulf %18, %15 : vector<8x128xf32>
    %20 = arith.select %17, %15, %19 : vector<8x128xi1>, vector<8x128xf32>
    %c0_14 = arith.constant 0 : index
    %c0_15 = arith.constant 0 : index
    %21 = vector.load %arg6[%c0_14, %c0_15] : memref<128x8xf32, #tpu.memory_space<vmem>>, vector<128x8xf32>
    %cst_16 = arith.constant dense<0.000000e+00> : vector<8x8xf32>
    %22 = tpu.matmul %20, %21, %cst_16 {dimension_numbers = #tpu.dot_dimension_numbers<[1], [0], [0], [1], [0, 0, 1, 1], [], []>} : vector<8x128xf32>, vector<128x8xf32>, vector<8x8xf32> -> vector<8x8xf32>
    %c0_17 = arith.constant 0 : index
    %c0_18 = arith.constant 0 : index
    %23 = vector.load %arg7[%c0_17, %c0_18] : memref<1x8xf32, #tpu.memory_space<vmem>>, vector<1x8xf32>
    %24 = vector.broadcast %23 : vector<1x8xf32> to vector<8x8xf32>
    %25 = arith.addf %22, %24 : vector<8x8xf32>
    %c0_19 = arith.constant 0 : index
    %c0_20 = arith.constant 0 : index
    %26 = vector.load %arg8[%c0_19, %c0_20] : memref<8x8xf32, #tpu.memory_space<vmem>>, vector<8x8xf32>
    tpu.vector_store %arg8[%c0_19, %c0_20], %25 {strides = array<i32>} : memref<8x8xf32, #tpu.memory_space<vmem>>, vector<8x8xf32>,
    return
  }
  func.func @transform_0(%arg0: i32) -> (i32, i32) {
    %c0_i32 = arith.constant 0 : i32
    %c0_i32_0 = arith.constant 0 : i32
    return %arg0, %c0_i32 : i32, i32
  }
  func.func @transform_1(%arg0: i32) -> (i32, i32) {
    %c0_i32 = arith.constant 0 : i32
    %c0_i32_0 = arith.constant 0 : i32
    %c0_i32_1 = arith.constant 0 : i32
    return %c0_i32, %c0_i32_0 : i32, i32
  }
  func.func @transform_2(%arg0: i32) -> (i32, i32) {
    %c0_i32 = arith.constant 0 : i32
    %c0_i32_0 = arith.constant 0 : i32
    %c0_i32_1 = arith.constant 0 : i32
    return %c0_i32, %c0_i32_0 : i32, i32
  }
  func.func @transform_3(%arg0: i32) -> (i32, i32) {
    %c0_i32 = arith.constant 0 : i32
    %c0_i32_0 = arith.constant 0 : i32
    %c0_i32_1 = arith.constant 0 : i32
    return %c0_i32, %c0_i32_0 : i32, i32
  }
  func.func @transform_4(%arg0: i32) -> (i32, i32) {
    %c0_i32 = arith.constant 0 : i32
    %c0_i32_0 = arith.constant 0 : i32
    %c0_i32_1 = arith.constant 0 : i32
    return %c0_i32, %c0_i32_0 : i32, i32
  }
  func.func @transform_5(%arg0: i32) -> (i32, i32) {
    %c0_i32 = arith.constant 0 : i32
    %c0_i32_0 = arith.constant 0 : i32
    %c0_i32_1 = arith.constant 0 : i32
    return %c0_i32, %c0_i32_0 : i32, i32
  }
  func.func @transform_6(%arg0: i32) -> (i32, i32) {
    %c0_i32 = arith.constant 0 : i32
    %c0_i32_0 = arith.constant 0 : i32
    %c0_i32_1 = arith.constant 0 : i32
    return %c0_i32, %c0_i32_0 : i32, i32
  }
  func.func @transform_7(%arg0: i32) -> (i32, i32) {
    %c0_i32 = arith.constant 0 : i32
    %c0_i32_0 = arith.constant 0 : i32
    return %arg0, %c0_i32 : i32, i32
  }
}

</mosaic_0001>

<bundles_post_ra>
// kernel: tpu_custom_call.1
= control target key start
LH: loop header
LB: loop body
LE: loop exit
PB: predicated region body
PF: predicated region fallthrough
CT: control target
= control target key end

     0   :  { %12 = vsyncpa [#allocation3], 0  ;;  %s739_s0 = inlined_call_operand.vmem [shape: f32[8,16], index: 0, kind: input, shape index: {}]   ;;  %s740_s1 = inlined_call_operand.hbm [shape: f32[16,128], index: 1, kind: input, shape index: {}]   ;;  %s741_s2 = inlined_call_operand.vmem [shape: f32[1,128], index: 2, kind: input, shape index: {}]   ;;  %s742_s3 = inlined_call_operand.vmem [shape: f32[128,128], index: 3, kind: input, shape index: {}]   ;;  %s743_s4 = inlined_call_operand.hbm [shape: f32[1,128], index: 4, kind: input, shape index: {}]   ;;  %s744_s5 = inlined_call_operand.vmem [shape: f32[128,8], index: 5, kind: input, shape index: {}]   ;;  %s745_s6 = inlined_call_operand.vmem [shape: f32[1,8], index: 6, kind: input, shape index: {}]   ;;  %s746_s7 = inlined_call_operand.hbm [shape: f32[8,8], index: 7, kind: output, shape index: {}]  }
   0x1   :  { %13 = vsyncpa [#allocation6], 0 }
   0x2   :  { %14 = vsyncpa [#allocation4], 0  ;;  %s538_s24 = smov [#allocation2]  }
   0x3   :  { %s22_s25 = sshll.u32 %s538_s24, 4  ;;  %s23_s25 = int_to_ptr.vmem [resolvable:$true] %s22_s25 }
   0x4   :  { %s480_s26 = scalar_lea.vmem %s23_s25, 256  ;;  %p485_p1 = scmp.lt.s32.totalorder %s23_s25, %s23_s25 }
   0x5   :  { %p481_p0 = scmp.ne.s32.totalorder %s23_s25, %s480_s26  ;;  %p486_p2 = scmp.lt.s32.totalorder %s480_s26, %s480_s26 }
   0x7   :  { %p487_p3 = por %p486_p2, %p485_p1 }
   0x9   :  { %p488_p4 = pnand %p487_p3, %p481_p0 }
   0xb   :  { %491 = shalt.err (!%p488_p4)
}
   0xc   :  { %s539_s27 = smov 128   ;;  %s540_s28 = smov 8  }
   0xd   :  { %28 = dma.hbm_to_vmem [thread:$0]  %s740_s1, 256, %s23_s25, [#allocation3], %s539_s27, %s539_s27, %s540_s28  }
   0xe   :  { %s541_s8 = smov [#allocation5]  }
   0xf   :  { %s39_s9 = sshll.u32 %s541_s8, 4  ;;  %s40_s9 = int_to_ptr.vmem [resolvable:$true] %s39_s9 }
  0x10   :  { %s500_s10 = scalar_lea.vmem %s40_s9, 16  ;;  %s504_s11 = scalar_lea.vmem %s40_s9, 32 }
  0x11   :  { %p501_p5 = scmp.ne.s32.totalorder %s40_s9, %s500_s10  ;;  %p505_p6 = scmp.lt.s32.totalorder %s40_s9, %s40_s9 }
  0x12   :  { %p506_p7 = scmp.lt.s32.totalorder %s504_s11, %s500_s10 }
  0x14   :  { %p507_p8 = por %p506_p7, %p505_p6 }
  0x16   :  { %p508_p9 = pnand %p507_p8, %p501_p5 }
  0x18   :  { %511 = shalt.err (!%p508_p9)
}
  0x19   :  { %42 = dma.hbm_to_vmem [thread:$0]  %s743_s4, 16, %s40_s9, [#allocation6]  }
  0x1a   :  { %532 = dma.done.wait [#allocation3], 256  }
  0x1b   :  { %533 = vsyncadd [#allocation3], 4294967040 }
  0x1c   :  { %534 = dma.done.wait [#allocation6], 16  }
  0x1d   :  { %535 = vsyncadd [#allocation6], 4294967280  ;;  %v542_v0 = vmov 0.0   ;;  %vm543_vm0 = vmmov 0   ;;  %v55_v1 = vld [vmem:[#allocation2 + $0x8] sm:$0xff]  ;;  %v54_v2 = vld [vmem:[#allocation2] sm:$0xff] }
  0x1e   :  { %388 = vmatprep.subr.mxu0 %v542_v0  ;;  %392 = vmatprep.mubr.msk.f32.mxu0 %vm543_vm0, %v542_v0  ;;  %v53_v3 = vld [vmem:[%s739_s0] sm:$0xff]  ;;  %vm63_vm1 = vcmask 130048   ;;  %v155_v4 = vld [vmem:[%s742_s3 + $0x78] sm:$0xff]  ;;  %v154_v5 = vld [vmem:[%s742_s3 + $0x70] sm:$0xff]  ;;  %s544_s26 = smov [#allocation7]   ;;  %vm329_vm4 = vcmask 64512  }
  0x1f   :  { %395 = vmatprep.subr.mxu1 %v542_v0  ;;  %427 = vmatprep.mubr.msk.f32.mxu1 %vm543_vm0, %v542_v0  ;;  %v153_v6 = vld [vmem:[%s742_s3 + $0x68] sm:$0xff]  ;;  %v152_v7 = vld [vmem:[%s742_s3 + $0x60] sm:$0xff]  ;;  %v151_v8 = vld [vmem:[%s742_s3 + $0x58] sm:$0xff]  ;;  %s337_s27 = sshll.u32 %s544_s26, 4  ;;  %s338_s27 = int_to_ptr.vmem [resolvable:$true] %s337_s27 }
  0x20   :  { %389 = vmatpush3.msra.mxu0 %v55_v1  ;;  %396 = vmatpush3.msra.mxu1 %v155_v4  ;;  %v150_v9 = vld [vmem:[%s742_s3 + $0x50] sm:$0xff]  ;;  %v149_v10 = vld [vmem:[%s742_s3 + $0x48] sm:$0xff]  ;;  %v148_v11 = vld [vmem:[%s742_s3 + $0x40] sm:$0xff]  ;;  %p517_p11 = scmp.lt.s32.totalorder %s338_s27, %s338_s27 }
  0x21   :  { %390 = vmatprep.subr.mxu0 %v542_v0  ;;  %397 = vmatprep.subr.mxu1 %v542_v0  ;;  %v147_v12 = vld [vmem:[%s742_s3 + $0x38] sm:$0xff]  ;;  %v146_v13 = vld [vmem:[%s742_s3 + $0x30] sm:$0xff]  ;;  %v145_v14 = vld [vmem:[%s742_s3 + $0x28] sm:$0xff] }
  0x22   :  { %391 = vmatpush3.msra.mxu0 %v54_v2  ;;  %398 = vmatpush3.msra.mxu1 %v154_v5  ;;  %v144_v15 = vld [vmem:[%s742_s3 + $0x20] sm:$0xff]  ;;  %v143_v16 = vld [vmem:[%s742_s3 + $0x18] sm:$0xff]  ;;  %v142_v17 = vld [vmem:[%s742_s3 + $0x10] sm:$0xff] }
  0x23   :  { %393 = vmatmul.mubr.msk.f32.vlgmr.msra.gmra.mxu0 %vm63_vm1, %v53_v3  ;;  %399 = vmatprep.subr.mxu1 %v542_v0  ;;  %v141_v18 = vld [vmem:[%s742_s3 + $0x8] sm:$0xff]  ;;  %v140_v19 = vld [vmem:[%s742_s3] sm:$0xff]  ;;  %v251_v20 = vld [vmem:[%s744_s5 + $0x78] sm:$0xff] }
  0x24   :  { %430 = vmatprep.subr.mxu0 %v542_v0  ;;  %400 = vmatpush3.msra.mxu1 %v153_v6  ;;  %v250_v21 = vld [vmem:[%s744_s5 + $0x70] sm:$0xff]  ;;  %v249_v22 = vld [vmem:[%s744_s5 + $0x68] sm:$0xff]  ;;  %v248_v23 = vld [vmem:[%s744_s5 + $0x60] sm:$0xff] }
  0x25   :  { %462 = vmatprep.mubr.msk.f32.mxu0 %vm543_vm0, %v542_v0  ;;  %401 = vmatprep.subr.mxu1 %v542_v0  ;;  %v247_v24 = vld [vmem:[%s744_s5 + $0x58] sm:$0xff]  ;;  %v246_v25 = vld [vmem:[%s744_s5 + $0x50] sm:$0xff]  ;;  %v245_v26 = vld [vmem:[%s744_s5 + $0x48] sm:$0xff] }
  0x26   :  { %402 = vmatpush3.msra.mxu1 %v152_v7  ;;  %431 = vmatpush3.msra.mxu0 %v251_v20  ;;  %v244_v27 = vld [vmem:[%s744_s5 + $0x40] sm:$0xff]  ;;  %v243_v28 = vld [vmem:[%s744_s5 + $0x38] sm:$0xff]  ;;  %v242_v29 = vld [vmem:[%s744_s5 + $0x30] sm:$0xff] }
  0x27   :  { %403 = vmatprep.subr.mxu1 %v542_v0  ;;  %432 = vmatprep.subr.mxu0 %v542_v0  ;;  %v241_v30 = vld [vmem:[%s744_s5 + $0x28] sm:$0xff]  ;;  %v240_v31 = vld [vmem:[%s744_s5 + $0x20] sm:$0xff]  ;;  %v239_v32 = vld [vmem:[%s744_s5 + $0x18] sm:$0xff] }
  0x28   :  { %404 = vmatpush3.msra.mxu1 %v151_v8  ;;  %433 = vmatpush3.msra.mxu0 %v250_v21  ;;  %v347_v33 = vld [vmem:[%s741_s2] ss:$0 sm:$0xff]  ;;  %v238_v39 = vld [vmem:[%s744_s5 + $0x10] sm:$0xff]  ;;  %v237_v40 = vld [vmem:[%s744_s5 + $0x8] sm:$0xff] }
  0x29   :  { %405 = vmatprep.subr.mxu1 %v542_v0  ;;  %434 = vmatprep.subr.mxu0 %v542_v0  ;;  %v236_v41 = vld [vmem:[%s744_s5] sm:$0xff]  ;;  %v349_v42 = vld [vmem:[#allocation5] ss:$0 sm:$0xff]  ;;  %s512_s5 = scalar_lea.vmem %s338_s27, 128 }
  0x2a   :  { %406 = vmatpush3.msra.mxu1 %v150_v9  ;;  %435 = vmatpush3.msra.mxu0 %v249_v22  ;;  %v350_v48 = vld [vmem:[%s745_s6] ss:$0 sm:$0xff]  ;;  %p513_p10 = scmp.ne.s32.totalorder %s338_s27, %s512_s5  ;;  %p518_p12 = scmp.lt.s32.totalorder %s512_s5, %s512_s5 }
  0x2b   :  { %407 = vmatprep.subr.mxu1 %v542_v0  ;;  %436 = vmatprep.subr.mxu0 %v542_v0 }
  0x2c   :  { %408 = vmatpush3.msra.mxu1 %v149_v10  ;;  %437 = vmatpush3.msra.mxu0 %v248_v23  ;;  %p519_p13 = por %p518_p12, %p517_p11 }
  0x2d   :  { %409 = vmatprep.subr.mxu1 %v542_v0  ;;  %438 = vmatprep.subr.mxu0 %v542_v0 }
  0x2e   :  { %410 = vmatpush3.msra.mxu1 %v148_v11  ;;  %439 = vmatpush3.msra.mxu0 %v247_v24  ;;  %p520_p0 = pnand %p519_p13, %p513_p10 }
  0x2f   :  { %411 = vmatprep.subr.mxu1 %v542_v0  ;;  %440 = vmatprep.subr.mxu0 %v542_v0 }
  0x30   :  { %412 = vmatpush3.msra.mxu1 %v147_v12  ;;  %441 = vmatpush3.msra.mxu0 %v246_v25 }
  0x31   :  { %413 = vmatprep.subr.mxu1 %v542_v0  ;;  %442 = vmatprep.subr.mxu0 %v542_v0 }
  0x32   :  { %414 = vmatpush3.msra.mxu1 %v146_v13  ;;  %443 = vmatpush3.msra.mxu0 %v245_v26 }
  0x33   :  { %415 = vmatprep.subr.mxu1 %v542_v0  ;;  %444 = vmatprep.subr.mxu0 %v542_v0 }
  0x34   :  { %416 = vmatpush3.msra.mxu1 %v145_v14  ;;  %445 = vmatpush3.msra.mxu0 %v244_v27 }
  0x35   :  { %417 = vmatprep.subr.mxu1 %v542_v0  ;;  %446 = vmatprep.subr.mxu0 %v542_v0 }
  0x36   :  { %418 = vmatpush3.msra.mxu1 %v144_v15  ;;  %447 = vmatpush3.msra.mxu0 %v243_v28 }
  0x37   :  { %419 = vmatprep.subr.mxu1 %v542_v0  ;;  %448 = vmatprep.subr.mxu0 %v542_v0 }
  0x38   :  { %420 = vmatpush3.msra.mxu1 %v143_v16  ;;  %449 = vmatpush3.msra.mxu0 %v242_v29 }
  0x39   :  { %421 = vmatprep.subr.mxu1 %v542_v0  ;;  %450 = vmatprep.subr.mxu0 %v542_v0 }
  0x3a   :  { %422 = vmatpush3.msra.mxu1 %v142_v17  ;;  %451 = vmatpush3.msra.mxu0 %v241_v30 }
  0x3b   :  { %423 = vmatprep.subr.mxu1 %v542_v0  ;;  %452 = vmatprep.subr.mxu0 %v542_v0 }
  0x3c   :  { %424 = vmatpush3.msra.mxu1 %v141_v18  ;;  %453 = vmatpush3.msra.mxu0 %v240_v31 }
  0x3d   :  { %425 = vmatprep.subr.mxu1 %v542_v0  ;;  %454 = vmatprep.subr.mxu0 %v542_v0 }
  0x3e   :  { %426 = vmatpush3.msra.mxu1 %v140_v19  ;;  %455 = vmatpush3.msra.mxu0 %v239_v32 }
  0x3f   :  { %456 = vmatprep.subr.mxu0 %v542_v0 }
  0x40   :  { %457 = vmatpush3.msra.mxu0 %v238_v39 }
  0x41   :  { %458 = vmatprep.subr.mxu0 %v542_v0 }
  0x42   :  { %459 = vmatpush3.msra.mxu0 %v237_v40 }
  0x43   :  { %460 = vmatprep.subr.mxu0 %v542_v0 }
  0x44   :  { %461 = vmatpush3.msra.mxu0 %v236_v41 }
  0xe3   :  { %v133_v34 = vpop.f32.mrf.mxu0 }
  0xe4   :  { %v134_v35 = vadd.f32 %v347_v33, %v133_v34 }
  0xe5   :  { %v394_v36 = vpop.f32.mrf.mxu0 }
  0xe6   :  { %v138_v37 = vmul.f32 0.01, %v134_v35  ;;  %vm137_vm2 = vcmp.gt.f32.partialorder %v134_v35, 0.0 }
  0xe8   :  { %v139_v38 = vsel %vm137_vm2, %v134_v35, %v138_v37 }
  0xe9   :  { %428 = vmatmul.mubr.f32.vlgmr.msra.gmra.mxu1 %v139_v38 }
 0x1a9   :  { %v229_v43 = vpop.f32.mrf.mxu1 }
 0x1aa   :  { %v230_v44 = vadd.f32 %v349_v42, %v229_v43 }
 0x1ab   :  { %v429_v45 = vpop.f32.mrf.mxu1 }
 0x1ac   :  { %vm233_vm3 = vcmp.gt.f32.partialorder %v230_v44, 0.0  ;;  %v234_v46 = vmul.f32 0.01, %v230_v44 }
 0x1ae   :  { %v235_v47 = vsel %vm233_vm3, %v230_v44, %v234_v46 }
 0x1af   :  { %463 = vmatmul.mubr.f32.vlgmr.msra.gmra.mxu0 %v235_v47 }
 0x26f   :  { %v325_v49 = vpop.f32.mrf.mxu0 }
 0x270   :  { %v326_v50 = vadd.f32 %v350_v48, %v325_v49 }
 0x271   :  { %v464_v51 = vpop.f32.mrf.mxu0 }
 0x272   :  { %330 = vst.msk [vmem:[#allocation7] sm:$0xff] %vm329_vm4, %v326_v50 }
 0x273   :  { %523 = shalt.err (!%p520_p0)
}
 0x274   :  { %340 = dma.vmem_to_hbm [thread:$0]  %s338_s27, 128, %s746_s7, [#allocation4]  }
 0x275   :  { %536 = dma.done.wait [#allocation4], 128  }
 0x276   :  { %537 = vsyncadd [#allocation4], 4294967168 }
 0x277   :  { %344 = vsyncpa [#allocation3], 1 }
 0x278   :  { %345 = vsyncpa [#allocation6], 1 }
 0x279   :  { %346 = vsyncpa [#allocation4], 1 }

</bundles_post_ra>
